<compile_context>
chip_gen: v7x
topology: tpu7x:2x2x1
jax: 0.10.0
libtpu: 0.0.40
codegen_flags: <defaults>
</compile_context>

<pallas_src>
import functools

import jax
import jax.numpy as jnp
from jax import lax
from jax.experimental import pallas as pl
from jax.experimental.pallas import tpu as pltpu


_LANES = 128
_VREG_ROWS = 8                           # (8, 128) f32 vreg granule
_BLOCK_ROWS = 4096                       # 4096*128*4 B = 2 MiB f32 tile per input
_FAST_PATH_MAX_ELEMS = 2 * 1024 * 1024   # <= 8 MiB/input f32 -> single fused kernel
_FAST_PATH_VMEM_BYTES = 48 << 20         # safe on v7x (64 MiB phys) and v5e/v6e (128 MiB)
_TILED_VMEM_BYTES = 32 << 20


# ----------------------------------------------------------------------------
# Fast path: whole slab resident in VMEM, inputs read from HBM exactly once.
# ----------------------------------------------------------------------------
def _berhu_fused_kernel(p_ref, t_ref, out_ref):
    # Upcast in-kernel (bf16 inputs keep their narrow HBM footprint).
    d = jnp.abs(t_ref[...].astype(jnp.float32) - p_ref[...].astype(jnp.float32))
    c = 0.2 * jnp.max(d)
    # c == 0 (identical inputs): d == 0 everywhere, the d <= c branch always wins.
    inv_2c = jnp.where(c > 0.0, 1.0 / (2.0 * c), 0.0)
    half_c = 0.5 * c
    loss = jnp.where(d <= c, d, d * d * inv_2c + half_c)
    out_ref[...] = jnp.sum(loss, keepdims=True)


# ----------------------------------------------------------------------------
# Tiled path: single two-phase kernel.
#   phase 0: accumulate max(|t - p|)           (VPU per tile, acc in VMEM)
#   phase 1: derive c once, accumulate the BerHu loss sum
# ----------------------------------------------------------------------------
def _berhu_two_phase_kernel(p_ref, t_ref, out_ref, max_acc, sum_acc, c_ref, *,
                            rows, block_rows, needs_mask):
    phase = pl.program_id(0)   # 0 = abs-max reduction, 1 = loss-sum reduction
    i = pl.program_id(1)       # tile index

    @pl.when((phase == 0) & (i == 0))
    def _():
        max_acc[...] = jnp.zeros_like(max_acc)   # |d| >= 0 -> 0 is the identity
        sum_acc[...] = jnp.zeros_like(sum_acc)

    d = jnp.abs(t_ref[...].astype(jnp.float32) - p_ref[...].astype(jnp.float32))
    if needs_mask:
        # Ragged last tile: rows past `rows` are OOB garbage (unspecified, not
        # zero).  Force them to 0 — neutral for both the max and the sum.
        # Emitted only when rows % block_rows != 0 (trace-time decision).
        row_ids = lax.broadcasted_iota(jnp.int32, d.shape, 0) + i * block_rows
        d = jnp.where(row_ids < rows, d, 0.0)

    d3 = d.reshape(-1, _VREG_ROWS, _LANES)   # VPU-only per-tile reduction shape

    @pl.when(phase == 0)
    def _():
        max_acc[...] = jnp.maximum(max_acc[...], jnp.max(d3, axis=0))

    @pl.when((phase == 1) & (i == 0))
    def _():
        # Cross-lane (XLU) reduce of the max accumulator, paid exactly once.
        c_ref[...] = 0.2 * jnp.max(max_acc[...], keepdims=True)

    @pl.when(phase == 1)
    def _():
        c = c_ref[...]                                       # (1, 1) -> splat
        inv_2c = jnp.where(c > 0.0, 1.0 / (2.0 * c), 0.0)    # c == 0 guarded
        half_c = 0.5 * c
        # Padding / masked elements have d == 0 <= c -> contribute exactly 0.
        loss = jnp.where(d <= c, d, d * d * inv_2c + half_c)
        sum_acc[...] += jnp.sum(loss.reshape(-1, _VREG_ROWS, _LANES), axis=0)

    @pl.when((phase == 1) & (i == pl.num_programs(1) - 1))
    def _():
        out_ref[...] = jnp.sum(sum_acc[...], keepdims=True)  # XLU, paid once


# ----------------------------------------------------------------------------
# Wrappers.
# ----------------------------------------------------------------------------
def _to_slab(x):
    """Flatten to a lane-dense (rows, 128) slab, copy-free whenever n % 128 == 0."""
    flat = x.reshape(-1)
    n = flat.shape[0]
    rows = pl.cdiv(n, _LANES)
    if n % _LANES != 0:
        # Rare fallback: zero-pad one partial lane row (zeros contribute 0 to
        # both max(|d|) and the loss sum; the mean divides by the true n).
        flat = jnp.pad(flat, (0, rows * _LANES - n))
    return flat.reshape(rows, _LANES), n


def _berhu_sum_fused(p2d, t2d):
    total = pl.pallas_call(
        _berhu_fused_kernel,
        out_shape=jax.ShapeDtypeStruct((1, 1), jnp.float32),
        compiler_params=pltpu.CompilerParams(
            vmem_limit_bytes=_FAST_PATH_VMEM_BYTES),
    )(p2d, t2d)
    return total[0, 0]


def _berhu_sum_tiled(p2d, t2d):
    rows = p2d.shape[0]
    if rows < _BLOCK_ROWS:
        # Anything smaller than one tile trivially fits VMEM; avoid a block
        # shape larger than the array.
        return _berhu_sum_fused(p2d, t2d)

    num_tiles = pl.cdiv(rows, _BLOCK_ROWS)
    needs_mask = (rows % _BLOCK_ROWS) != 0

    kernel = functools.partial(
        _berhu_two_phase_kernel,
        rows=rows, block_rows=_BLOCK_ROWS, needs_mask=needs_mask)

    tile = pl.BlockSpec((_BLOCK_ROWS, _LANES), lambda phase, i: (i, 0))
    total = pl.pallas_call(
        kernel,
        out_shape=jax.ShapeDtypeStruct((1, 1), jnp.float32),
        grid=(2, num_tiles),
        in_specs=[tile, tile],
        out_specs=pl.BlockSpec((1, 1), lambda phase, i: (0, 0)),
        scratch_shapes=[
            pltpu.VMEM((_VREG_ROWS, _LANES), jnp.float32),   # max accumulator
            pltpu.VMEM((_VREG_ROWS, _LANES), jnp.float32),   # sum accumulator
            pltpu.VMEM((1, 1), jnp.float32),                 # c = 0.2 * max|d|
        ],
        compiler_params=pltpu.CompilerParams(
            dimension_semantics=("arbitrary", "arbitrary"),
            vmem_limit_bytes=_TILED_VMEM_BYTES),
    )(p2d, t2d)
    return total[0, 0]


def berhu_loss(pred, target, *, force_path=None):
    """BerHu loss matching the PyTorch reference semantics (float32 scalar)."""
    p2d, n = _to_slab(pred)
    t2d, n_t = _to_slab(target)
    assert n == n_t, "pred and target must have the same number of elements"
    if force_path is None:
        use_fast = n <= _FAST_PATH_MAX_ELEMS
    else:
        use_fast = force_path == "fast"
    total = _berhu_sum_fused(p2d, t2d) if use_fast else _berhu_sum_tiled(p2d, t2d)
    return (total / jnp.float32(n)).astype(jnp.float32)


if __name__ == "__main__":
    def ref_loss(p, t):
        diff = jnp.abs(t.astype(jnp.float32) - p.astype(jnp.float32))
        c = 0.2 * jnp.max(diff)
        return jnp.mean(jnp.where(diff <= c, diff,
                                  (diff * diff + c * c) / (2.0 * c)))

    key = jax.random.PRNGKey(0)
    k1, k2, k3, k4, k5, k6 = jax.random.split(key, 6)

    # 1) Small NCHW depth-estimation-style input -> fast fused path.
    pred = jax.random.normal(k1, (2, 4, 16, 16), dtype=jnp.float32)
    target = jax.random.normal(k2, (2, 4, 16, 16), dtype=jnp.float32)
    got = jax.block_until_ready(berhu_loss(pred, target))
    want = ref_loss(pred, target)
    assert jnp.allclose(got, want, rtol=1e-5, atol=1e-6), (got, want)

    # 2) Ragged element count (n % 128 != 0) -> exercises the lane-pad fallback.
    pred_r = jax.random.normal(k3, (2, 3, 15, 17), dtype=jnp.float32)
    target_r = jax.random.normal(k4, (2, 3, 15, 17), dtype=jnp.float32)
    got_r = jax.block_until_ready(berhu_loss(pred_r, target_r))
    want_r = ref_loss(pred_r, target_r)
    assert jnp.allclose(got_r, want_r, rtol=1e-5, atol=1e-6), (got_r, want_r)

    # 3) Larger input forced down the tiled two-phase path (6400 rows -> 2
    #    tiles, ragged last tile -> exercises the in-kernel tail mask).
    pred_t = jax.random.normal(k5, (2, 4, 320, 320), dtype=jnp.float32)
    target_t = jax.random.normal(k6, (2, 4, 320, 320), dtype=jnp.float32)
    got_t = jax.block_until_ready(berhu_loss(pred_t, target_t, force_path="tiled"))
    want_t = ref_loss(pred_t, target_t)
    assert jnp.allclose(got_t, want_t, rtol=1e-4, atol=1e-6), (got_t, want_t)

    print("KERNEL_OK")
</pallas_src>

<mosaic_0001>
module attributes {stable_mosaic.version = 11 : i64} {
  func.func @_berhu_fused_kernel(%arg0: memref<16x128xf32, #tpu.memory_space<vmem>>, %arg1: memref<16x128xf32, #tpu.memory_space<vmem>>, %arg2: memref<1x1xf32, #tpu.memory_space<vmem>>) attributes {dimension_semantics = [], scalar_prefetch = 0 : i64, scratch_operands = 0 : i64, tpu.core_type = #tpu.core_type<tc>} {
    %c0 = arith.constant 0 : index
    %c0_0 = arith.constant 0 : index
    %0 = vector.load %arg1[%c0, %c0_0] : memref<16x128xf32, #tpu.memory_space<vmem>>, vector<16x128xf32>
    %c0_1 = arith.constant 0 : index
    %c0_2 = arith.constant 0 : index
    %1 = vector.load %arg0[%c0_1, %c0_2] : memref<16x128xf32, #tpu.memory_space<vmem>>, vector<16x128xf32>
    %2 = arith.subf %0, %1 : vector<16x128xf32>
    %3 = math.absf %2 : vector<16x128xf32>
    %4 = vector.shape_cast %3 : vector<16x128xf32> to vector<1x16x128xf32>
    %cst = arith.constant dense<0xFF800000> : vector<1xf32>
    %5 = vector.multi_reduction <maximumf>, %4, %cst [1, 2] : vector<1x16x128xf32> to vector<1xf32>
    %6 = vector.shape_cast %5 : vector<1xf32> to vector<1x1x1xf32>
    %7 = vector.extract %6[0, 0, 0] : f32 from vector<1x1x1xf32>
    %cst_3 = arith.constant 2.000000e-01 : f32
    %8 = arith.mulf %cst_3, %7 : f32
    %cst_4 = arith.constant 0.000000e+00 : f32
    %9 = arith.cmpf ogt, %8, %cst_4 : f32
    %cst_5 = arith.constant 2.000000e+00 : f32
    %10 = arith.mulf %cst_5, %8 : f32
    %cst_6 = arith.constant 1.000000e+00 : f32
    %11 = arith.divf %cst_6, %10 : f32
    %cst_7 = arith.constant 0.000000e+00 : f32
    %12 = arith.select %9, %11, %cst_7 : f32
    %cst_8 = arith.constant 5.000000e-01 : f32
    %13 = arith.mulf %cst_8, %8 : f32
    %14 = vector.broadcast %8 : f32 to vector<16x128xf32>
    %15 = arith.cmpf ole, %3, %14 : vector<16x128xf32>
    %16 = arith.mulf %3, %3 : vector<16x128xf32>
    %17 = vector.broadcast %12 : f32 to vector<16x128xf32>
    %18 = arith.mulf %16, %17 : vector<16x128xf32>
    %19 = vector.broadcast %13 : f32 to vector<16x128xf32>
    %20 = arith.addf %18, %19 : vector<16x128xf32>
    %21 = arith.select %15, %3, %20 : vector<16x128xi1>, vector<16x128xf32>
    %22 = vector.shape_cast %21 : vector<16x128xf32> to vector<1x16x128xf32>
    %cst_9 = arith.constant dense<0.000000e+00> : vector<1xf32>
    %23 = vector.multi_reduction <add>, %22, %cst_9 [1, 2] : vector<1x16x128xf32> to vector<1xf32>
    %24 = vector.shape_cast %23 : vector<1xf32> to vector<1x1x1xf32>
    %25 = vector.extract %24[0, 0, 0] : f32 from vector<1x1x1xf32>
    %26 = vector.broadcast %25 : f32 to vector<1x1xf32>
    %c0_10 = arith.constant 0 : index
    %c0_11 = arith.constant 0 : index
    %27 = vector.load %arg2[%c0_10, %c0_11] : memref<1x1xf32, #tpu.memory_space<vmem>>, vector<1x1xf32>
    tpu.vector_store %arg2[%c0_10, %c0_11], %26 {strides = array<i32>} : memref<1x1xf32, #tpu.memory_space<vmem>>, vector<1x1xf32>,
    return
  }
}

</mosaic_0001>

<bundles_post_ra>
// kernel: tpu_custom_call.1
= control target key start
LH: loop header
LB: loop body
LE: loop exit
PB: predicated region body
PF: predicated region fallthrough
CT: control target
= control target key end

     0   :  { %7 = vsyncpa [#allocation3], 0  ;;  %s249_s0 = inlined_call_operand.hbm [shape: f32[16,128], index: 0, kind: input, shape index: {}]   ;;  %s250_s1 = inlined_call_operand.hbm [shape: f32[16,128], index: 1, kind: input, shape index: {}]   ;;  %s251_s2 = inlined_call_operand.hbm [shape: f32[1,1], index: 2, kind: output, shape index: {}]  }
   0x1   :  { %8 = vsyncpa [#allocation6], 0 }
   0x2   :  { %9 = vsyncpa [#allocation4], 0  ;;  %s193_s9 = smov [#allocation2]   ;;  %s121_s13 = scalar_lea.hbm %s249_s0, 256 }
   0x3   :  { %s15_s10 = sshll.u32 %s193_s9, 4  ;;  %p122_p0 = scmp.ne.s32.totalorder %s249_s0, %s121_s13  ;;  %s16_s10 = int_to_ptr.vmem [resolvable:$true] %s15_s10 }
   0x4   :  { %p125_p1 = scmp.lt.u32.totalorder %s121_s13, %s249_s0 }
   0x6   :  { %p127_p2 = pnand %p125_p1, %p122_p0 }
   0x8   :  { %130 = shalt.err (!%p127_p2)
}
   0x9   :  { %s131_s18 = scalar_lea.vmem %s16_s10, 256  ;;  %p136_p4 = scmp.lt.s32.totalorder %s16_s10, %s16_s10 }
   0xa   :  { %p132_p3 = scmp.ne.s32.totalorder %s16_s10, %s131_s18  ;;  %p137_p5 = scmp.lt.s32.totalorder %s131_s18, %s131_s18 }
   0xc   :  { %p138_p6 = por %p137_p5, %p136_p4 }
   0xe   :  { %p139_p7 = pnand %p138_p6, %p132_p3 }
  0x10   :  { %142 = shalt.err (!%p139_p7)
}
  0x11   :  { %s194_s19 = smov 128   ;;  %s195_s20 = smov 8  }
  0x12   :  { %21 = dma.hbm_to_vmem [thread:$0]  %s249_s0, 256, %s16_s10, [#allocation3], %s194_s19, %s194_s19, %s195_s20  }
  0x13   :  { %s196_s23 = smov [#allocation5]   ;;  %s143_s27 = scalar_lea.hbm %s250_s1, 256 }
  0x14   :  { %s27_s24 = sshll.u32 %s196_s23, 4  ;;  %p144_p8 = scmp.ne.s32.totalorder %s250_s1, %s143_s27  ;;  %s28_s24 = int_to_ptr.vmem [resolvable:$true] %s27_s24 }
  0x15   :  { %p147_p9 = scmp.lt.u32.totalorder %s143_s27, %s250_s1 }
  0x17   :  { %p149_p10 = pnand %p147_p9, %p144_p8 }
  0x19   :  { %152 = shalt.err (!%p149_p10)
}
  0x1a   :  { %s153_s4 = scalar_lea.vmem %s28_s24, 256  ;;  %p158_p12 = scmp.lt.s32.totalorder %s28_s24, %s28_s24 }
  0x1b   :  { %p154_p11 = scmp.ne.s32.totalorder %s28_s24, %s153_s4  ;;  %p159_p13 = scmp.lt.s32.totalorder %s153_s4, %s153_s4 }
  0x1d   :  { %p160_p0 = por %p159_p13, %p158_p12 }
  0x1f   :  { %p161_p1 = pnand %p160_p0, %p154_p11 }
  0x21   :  { %164 = shalt.err (!%p161_p1)
}
  0x22   :  { %33 = dma.hbm_to_vmem [thread:$0]  %s250_s1, 256, %s28_s24, [#allocation6], %s194_s19, %s194_s19, %s195_s20  }
  0x23   :  { %187 = dma.done.wait [#allocation3], 256  }
  0x24   :  { %188 = vsyncadd [#allocation3], 4294967040 }
  0x25   :  { %189 = dma.done.wait [#allocation6], 256  }
  0x26   :  { %190 = vsyncadd [#allocation6], 4294967040  ;;  %v40_v0 = vld [vmem:[#allocation5] sm:$0xff]  ;;  %v41_v1 = vld [vmem:[#allocation5 + $0x8] sm:$0xff]  ;;  %s197_s10 = smov [#allocation7]   ;;  %vm90_vm2 = vcmask 0  }
  0x27   :  { %v42_v2 = vld [vmem:[#allocation2] sm:$0xff]  ;;  %v43_v3 = vld [vmem:[#allocation2 + $0x8] sm:$0xff]  ;;  %s98_s11 = sshll.u32 %s197_s10, 4  ;;  %s99_s11 = int_to_ptr.vmem [resolvable:$true] %s98_s11 }
  0x28   :  { %v44_v4 = vsub.f32 %v40_v0, %v42_v2  ;;  %v45_v5 = vsub.f32 %v41_v1, %v43_v3  ;;  %s165_s13 = scalar_lea.vmem %s99_s11, 16  ;;  %s169_s14 = scalar_lea.vmem %s99_s11, 32 }
  0x29   :  { %p166_p3 = scmp.ne.s32.totalorder %s99_s11, %s165_s13  ;;  %p170_p4 = scmp.lt.s32.totalorder %s99_s11, %s99_s11 }
  0x2a   :  { %v46_v6 = vand.u32 2147483647, %v44_v4  ;;  %v47_v7 = vand.u32 2147483647, %v45_v5  ;;  %p171_p5 = scmp.lt.s32.totalorder %s169_s14, %s165_s13 }
  0x2c   :  { %v48_v8 = vmax.f32 %v46_v6, %v47_v7  ;;  %v69_v18 = vmul.f32 %v46_v6, %v46_v6  ;;  %v70_v19 = vmul.f32 %v47_v7, %v47_v7  ;;  %p172_p6 = por %p171_p5, %p170_p4 }
  0x2e   :  { %49 = vmax.xlane.f32.xlu0 %v48_v8  ;;  %p173_p7 = pnand %p172_p6, %p166_p3 }
  0xbb   :  { %v50_v9 = vpop.xlane.xlu0 %49 }
  0xbc   :  { %v51_v10 = vrot.slane %v50_v9, 4 }
  0xbe   :  { %v52_v11 = vmax.f32 %v50_v9, %v51_v10 }
  0xc0   :  { %v53_v12 = vrot.slane %v52_v11, 2 }
  0xc2   :  { %v54_v13 = vmax.f32 %v52_v11, %v53_v12 }
  0xc4   :  { %v55_v14 = vrot.slane %v54_v13, 1 }
  0xc6   :  { %v56_v15 = vmax.f32 %v54_v13, %v55_v14 }
  0xc8   :  { %108 = vpush %v56_v15 }
  0xf9   :  { %s109_s1 = spop %108 }
  0xfa   :  { %s58_s6 = smul.f32 0.2, %s109_s1 }
  0xfc   :  { %s60_s7 = smul.f32 2.0, %s58_s6  ;;  %p59_p2 = scmp.gt.f32.partialorder %s58_s6, 0.0  ;;  %v66_v23 = vstv %s58_s6 }
  0xfd   :  { %s65_s9 = smul.f32 0.5, %s58_s6  ;;  %vm67_vm0 = vcmp.le.f32.partialorder %v46_v6, %v66_v23  ;;  %vm68_vm1 = vcmp.le.f32.partialorder %v47_v7, %v66_v23 }
  0xfe   :  { %v61_v16 = vstv %s60_s7 }
  0xff   :  { %119 = vrcp.f32 %v61_v16  ;;  %v74_v24 = vstv %s65_s9 }
 0x109   :  { %v120_v17 = vpop.eup %119 }
 0x10a   :  { %110 = vpush %v120_v17 }
 0x13b   :  { %s111_s8 = spop %110 }
 0x13c   :  { %s253_s8 = smov (!%p59_p2, %s111_s8), 0.0 }
 0x13d   :  { %v71_v20 = vstv %s253_s8 }
 0x13e   :  { %v72_v21 = vmul.f32 %v71_v20, %v69_v18  ;;  %v73_v22 = vmul.f32 %v71_v20, %v70_v19 }
 0x140   :  { %v75_v25 = vadd.f32 %v74_v24, %v72_v21  ;;  %v76_v26 = vadd.f32 %v74_v24, %v73_v22 }
 0x142   :  { %v77_v27 = vsel %vm67_vm0, %v46_v6, %v75_v25  ;;  %v78_v28 = vsel %vm68_vm1, %v47_v7, %v76_v26 }
 0x143   :  { %v79_v29 = vadd.f32 %v78_v28, %v77_v27 }
 0x145   :  { %80 = vadd.xlane.f32.xlu0 %v79_v29 }
 0x1d2   :  { %v81_v30 = vpop.xlane.xlu0 %80 }
 0x1d3   :  { %v82_v31 = vrot.slane %v81_v30, 4 }
 0x1d5   :  { %v83_v32 = vadd.f32 %v82_v31, %v81_v30 }
 0x1d7   :  { %v84_v33 = vrot.slane %v83_v32, 2 }
 0x1d9   :  { %v85_v34 = vadd.f32 %v84_v33, %v83_v32 }
 0x1db   :  { %v86_v35 = vrot.slane %v85_v34, 1 }
 0x1dd   :  { %v87_v36 = vadd.f32 %v86_v35, %v85_v34 }
 0x1df   :  { %112 = vpush %v87_v36 }
 0x210   :  { %s113_s12 = spop %112 }
 0x211   :  { %v89_v37 = vstv %s113_s12 }
 0x212   :  { %91 = vst.msk [vmem:[#allocation7] sm:$0x1] %vm90_vm2, %v89_v37 }
 0x213   :  { %176 = shalt.err (!%p173_p7)
}
 0x214   :  { %s177_s17 = scalar_lea.hbm %s251_s2, 16 }
 0x215   :  { %p178_p8 = scmp.ne.s32.totalorder %s251_s2, %s177_s17  ;;  %p181_p9 = scmp.lt.u32.totalorder %s177_s17, %s251_s2 }
 0x217   :  { %p183_p10 = pnand %p181_p9, %p178_p8 }
 0x219   :  { %186 = shalt.err (!%p183_p10)
}
 0x21a   :  { %101 = dma.vmem_to_hbm [thread:$0]  %s99_s11, 16, %s251_s2, [#allocation4]  }
 0x21b   :  { %191 = dma.done.wait [#allocation4], 16  }
 0x21c   :  { %192 = vsyncadd [#allocation4], 4294967280 }
 0x21d   :  { %105 = vsyncpa [#allocation3], 1 }
 0x21e   :  { %106 = vsyncpa [#allocation6], 1 }
 0x21f   :  { %107 = vsyncpa [#allocation4], 1 }

</bundles_post_ra>
